<compile_context>
chip_gen: v6e
topology: v6e:2x2x1
jax: 0.10.0
libtpu: 0.0.40
codegen_flags: <defaults>
</compile_context>

<pallas_src>
import numpy as np
import jax
import jax.numpy as jnp
from jax.experimental import pallas as pl
from jax.experimental.pallas import tpu as pltpu

SIZE = 16            # sizewh (output spatial / offset spatial)
KWH = 3              # kernel height/width
IN_C = 3             # input channels (from weight shape (1, 3, 3, 3))
UP = 18              # F.interpolate target size
K2 = KWH * KWH       # 9 kernel taps
HW_IN = SIZE * SIZE  # 256
HW_UP = UP * UP      # 324
CQ = IN_C * HW_IN    # 768 (fused contraction dim: channel x input pixel)


# ---------------------------------------------------------------------------
# Constant-matrix construction (parameter setup, plain numpy glue, runs once)
# ---------------------------------------------------------------------------
def _interp_matrix_1d(in_size, out_size):
    """PyTorch bilinear (align_corners=False) 1-D interpolation matrix (out, in)."""
    A = np.zeros((out_size, in_size), dtype=np.float64)
    scale = in_size / out_size
    for o in range(out_size):
        src = scale * (o + 0.5) - 0.5
        if src < 0.0:
            src = 0.0
        i0 = int(np.floor(src))
        i1 = i0 + 1 if i0 < in_size - 1 else i0
        lam = src - i0
        A[o, i0] += 1.0 - lam
        A[o, i1] += lam
    return A


def _deform_sampling_matrix(offset_np):
    """S[(k*HW_IN + h*SIZE + w), (y*UP + x)] = bilinear weight for sampling the
    interpolated 18x18 map at (h + i + dy, w + j + dx), zero padding outside
    (torchvision deform_conv2d convention: offset channels are (dy, dx) pairs)."""
    S = np.zeros((K2 * HW_IN, HW_UP), dtype=np.float64)
    for i in range(KWH):
        for j in range(KWH):
            k = i * KWH + j
            for h in range(SIZE):
                for w in range(SIZE):
                    dy = float(offset_np[0, 2 * k, h, w])
                    dx = float(offset_np[0, 2 * k + 1, h, w])
                    py = h + i + dy      # stride=1, pad=0, dilation=1
                    px = w + j + dx
                    row = k * HW_IN + h * SIZE + w
                    if py <= -1 or py >= UP or px <= -1 or px >= UP:
                        continue
                    y0 = int(np.floor(py)); x0 = int(np.floor(px))
                    y1, x1 = y0 + 1, x0 + 1
                    ly, lx = py - y0, px - x0
                    for (yy, xx, wgt) in ((y0, x0, (1 - ly) * (1 - lx)),
                                          (y0, x1, (1 - ly) * lx),
                                          (y1, x0, ly * (1 - lx)),
                                          (y1, x1, ly * lx)):
                        if 0 <= yy <= UP - 1 and 0 <= xx <= UP - 1:
                            S[row, yy * UP + xx] += wgt
    return S


def _build_fused_matrix(weight_np, offset_np, mask_np):
    """Fuse interp -> deform-sample -> mask -> conv weight -> tap-sum into one
    constant matrix W_total of shape (CQ, HW_IN) = (768, 256)."""
    A = _interp_matrix_1d(SIZE, UP)                         # (18, 16)
    interp = np.kron(A, A)                                  # (324, 256): [y*18+x, h*16+w]
    samp = _deform_sampling_matrix(offset_np)               # (2304, 324)
    M = (samp @ interp).reshape(K2, HW_IN, HW_IN)           # (k, p_out, q_in)
    w_ck = weight_np[0].reshape(IN_C, K2)                   # (c, k), k = i*3 + j
    mask_kp = mask_np[0].reshape(K2, HW_IN)                 # (k, p_out)
    W = np.einsum('ck,kp,kpq->cqp', w_ck, mask_kp, M)       # (c, q_in, p_out)
    return W.reshape(CQ, HW_IN), A                          # row index = c*256 + q


# ---------------------------------------------------------------------------
# Pallas kernel (hot path): single MXU matmul, in-kernel bf16 cast, f32 acc
# ---------------------------------------------------------------------------
def dcn_kernel(x_ref, w_ref, o_ref):
    # x_ref: (B, 768) f32  flattened input (c*256 + h*16 + w); cast here so the
    #        wrapper has no separate XLA convert launch.
    # w_ref: (768, 256) bf16 fused constant operator
    # o_ref: (B, 256) f32    flattened 16x16 output (N=256 -> lane-dense stores)
    o_ref[...] = jnp.dot(x_ref[...].astype(jnp.bfloat16), w_ref[...],
                         preferred_element_type=jnp.float32)


@jax.jit
def deform_forward(x, w_total):
    # x: (B, 3, 16, 16) f32;  w_total: (768, 256) bf16 (resident device array)
    B = x.shape[0]
    x_flat = x.reshape(B, CQ)          # free row-major bitcast, stays f32
    out = pl.pallas_call(
        dcn_kernel,
        out_shape=jax.ShapeDtypeStruct((B, HW_IN), jnp.float32),
        # Gridless: whole arrays live in VMEM for the duration of the call; no
        # 1-step grid scaffolding, no double-buffered copy of the 384 KiB W.
        in_specs=[
            pl.BlockSpec(memory_space=pltpu.MemorySpace.VMEM),
            pl.BlockSpec(memory_space=pltpu.MemorySpace.VMEM),
        ],
        out_specs=pl.BlockSpec(memory_space=pltpu.MemorySpace.VMEM),
        cost_estimate=pl.CostEstimate(
            flops=2 * B * CQ * HW_IN,
            bytes_accessed=CQ * HW_IN * 2 + B * CQ * 4 + B * HW_IN * 4,
            transcendentals=0,
        ),
    )(x_flat, w_total)
    return out.reshape(B, 1, SIZE, SIZE)


# ---------------------------------------------------------------------------
# Pure-numpy reference (independent of the fused-matrix formulation)
# ---------------------------------------------------------------------------
def _bilinear_zero(img, py, px):
    C, H, W = img.shape
    if py <= -1 or py >= H or px <= -1 or px >= W:
        return np.zeros((C,))
    y0 = int(np.floor(py)); x0 = int(np.floor(px))
    y1, x1 = y0 + 1, x0 + 1
    ly, lx = py - y0, px - x0
    out = np.zeros((C,))
    for (yy, xx, wgt) in ((y0, x0, (1 - ly) * (1 - lx)), (y0, x1, (1 - ly) * lx),
                          (y1, x0, ly * (1 - lx)), (y1, x1, ly * lx)):
        if 0 <= yy < H and 0 <= xx < W:
            out += wgt * img[:, yy, xx]
    return out


def reference(x_np, weight_np, offset_np, mask_np, A_h, A_w):
    B = x_np.shape[0]
    outs = []
    for b in range(B):
        xc = np.asarray(x_np, dtype=np.float64)[b]                   # (C, 16, 16)
        x18 = np.einsum('Hh,chw,Ww->cHW', A_h, xc, A_w)              # (C, 18, 18)
        out = np.zeros((SIZE, SIZE))
        for h in range(SIZE):
            for w in range(SIZE):
                val = 0.0
                for i in range(KWH):
                    for j in range(KWH):
                        k = i * KWH + j
                        py = h + i + offset_np[0, 2 * k, h, w]
                        px = w + j + offset_np[0, 2 * k + 1, h, w]
                        s = _bilinear_zero(x18, py, px)
                        val += mask_np[0, k, h, w] * np.dot(weight_np[0, :, i, j], s)
                out[h, w] = val
        outs.append(out.reshape(1, SIZE, SIZE))
    return np.stack(outs, axis=0)


if __name__ == "__main__":
    key = jax.random.PRNGKey(0)
    kx, kw, ko, km = jax.random.split(key, 4)

    # Module "parameters" (torch.rand -> uniform[0,1)), deterministic in-script.
    weight = jax.random.uniform(kw, (1, IN_C, KWH, KWH), dtype=jnp.float32)
    offset = jax.random.uniform(ko, (1, 2 * K2, SIZE, SIZE), dtype=jnp.float32)
    mask = jax.random.uniform(km, (1, K2, SIZE, SIZE), dtype=jnp.float32)
    # Input: NCHW; batch must equal the offset/mask batch (= 1) to match
    # torchvision deform_conv2d semantics.  The kernel itself accepts any B.
    BATCH = 1
    x = jax.random.uniform(kx, (BATCH, IN_C, SIZE, SIZE), dtype=jnp.float32)

    weight_np = np.asarray(jax.device_get(weight), dtype=np.float64)
    offset_np = np.asarray(jax.device_get(offset), dtype=np.float64)
    mask_np = np.asarray(jax.device_get(mask), dtype=np.float64)
    x_np = np.asarray(jax.device_get(x), dtype=np.float64)

    # Build the fused constant operator once (setup), keep it resident on device
    # as bf16 (halves the dominant constant stream; MXU accumulates in f32).
    # TODO(synk): if offset/mask/weight ever become per-forward inputs, this
    # host-side precompute must move on-device (it is far too slow per call).
    W_total_np, A = _build_fused_matrix(weight_np, offset_np, mask_np)
    w_total = jnp.asarray(W_total_np, dtype=jnp.bfloat16)             # (768, 256)

    out = deform_forward(x, w_total)
    out = jax.block_until_ready(out)

    ref = reference(x_np, weight_np, offset_np, mask_np, A, A)
    assert out.shape == (BATCH, 1, SIZE, SIZE), out.shape
    assert np.allclose(np.asarray(out, dtype=np.float64), ref, rtol=5e-2, atol=5e-2), (
        "max abs diff %g" % np.max(np.abs(np.asarray(out, dtype=np.float64) - ref)))

    print("KERNEL_OK")
</pallas_src>

<mosaic_0001>
module attributes {stable_mosaic.version = 11 : i64} {
  func.func @dcn_kernel(%arg0: memref<1x768xf32, #tpu.memory_space<vmem>>, %arg1: memref<768x256xbf16, #tpu.memory_space<vmem>>, %arg2: memref<1x256xf32, #tpu.memory_space<vmem>>) attributes {dimension_semantics = [], scalar_prefetch = 0 : i64, scratch_operands = 0 : i64, tpu.core_type = #tpu.core_type<tc>} {
    %c0 = arith.constant 0 : index
    %c0_0 = arith.constant 0 : index
    %0 = vector.load %arg0[%c0, %c0_0] : memref<1x768xf32, #tpu.memory_space<vmem>>, vector<1x768xf32>
    %1 = arith.truncf %0 : vector<1x768xf32> to vector<1x768xbf16>
    %c0_1 = arith.constant 0 : index
    %c0_2 = arith.constant 0 : index
    %2 = vector.load %arg1[%c0_1, %c0_2] : memref<768x256xbf16, #tpu.memory_space<vmem>>, vector<768x256xbf16>
    %cst = arith.constant dense<0.000000e+00> : vector<1x256xf32>
    %3 = tpu.matmul %1, %2, %cst {dimension_numbers = #tpu.dot_dimension_numbers<[1], [0], [0], [1], [0, 0, 1, 1], [], []>} : vector<1x768xbf16>, vector<768x256xbf16>, vector<1x256xf32> -> vector<1x256xf32>
    %c0_3 = arith.constant 0 : index
    %c0_4 = arith.constant 0 : index
    %4 = vector.load %arg2[%c0_3, %c0_4] : memref<1x256xf32, #tpu.memory_space<vmem>>, vector<1x256xf32>
    tpu.vector_store %arg2[%c0_3, %c0_4], %3 {strides = array<i32>} : memref<1x256xf32, #tpu.memory_space<vmem>>, vector<1x256xf32>,
    return
  }
}

</mosaic_0001>

<bundles_post_ra>
// kernel: deform_forward.1
= control target key start
LH: loop header
LB: loop body
LE: loop exit
PB: predicated region body
PF: predicated region fallthrough
CT: control target
= control target key end

     0   :  { %7 = vsyncpa [#allocation3], 0  ;;  %s1056_s9 = smov [#allocation2]   ;;  %s1103_s0 = inlined_call_operand.vmem [shape: f32[1,768], index: 0, kind: input, shape index: {}]   ;;  %s1104_s1 = inlined_call_operand.hbm [shape: bf16[768,256], index: 1, kind: input, shape index: {}]   ;;  %s1105_s2 = inlined_call_operand.vmem [shape: f32[1,256], index: 2, kind: output, shape index: {}]  }
   0x1   :  { %s15_s10 = sshll.u32 %s1056_s9, 4  ;;  %s16_s10 = int_to_ptr.vmem [resolvable:$true] %s15_s10 }
   0x2   :  { %s1042_s11 = scalar_lea.vmem %s16_s10, 12288  ;;  %p1047_p1 = scmp.lt.s32.totalorder %s16_s10, %s16_s10 }
   0x3   :  { %p1043_p0 = scmp.ne.s32.totalorder %s16_s10, %s1042_s11  ;;  %p1048_p2 = scmp.lt.s32.totalorder %s1042_s11, %s1042_s11 }
   0x5   :  { %p1049_p3 = por %p1048_p2, %p1047_p1 }
   0x7   :  { %p1050_p4 = pnand %p1049_p3, %p1043_p0 }
   0x9   :  { %1053 = shalt.err (!%p1050_p4)
}
   0xa   :  { %s1057_s12 = smov 128   ;;  %s1058_s13 = smov 8  }
   0xb   :  { %21 = dma.hbm_to_vmem [thread:$0]  %s1104_s1, 12288, %s16_s10, [#allocation3], %s1057_s12, %s1057_s12, %s1058_s13  }
   0xc   :  { %1054 = dma.done.wait [#allocation3], 12288  }
   0xd   :  { %1055 = vsyncadd [#allocation3], 4294955008  ;;  %v890_v0 = vld [vmem:[#allocation2 + $0x74] ss:$8 sps:$4 sm:$0xff]   ;;  %v894_v2 = vld [vmem:[#allocation2 + $0x70] ss:$8 sps:$4 sm:$0xff]   ;;  %v27_v36 = vlaneseq }
   0xe   :  { %v892_v1 = vld [vmem:[#allocation2 + $0x174] ss:$8 sps:$4 sm:$0xff]   ;;  %639 = vmatprep.subr.bf16.mxu0 %v890_v0  ;;  %v895_v3 = vld [vmem:[#allocation2 + $0x170] ss:$8 sps:$4 sm:$0xff]   ;;  %v896_v4 = vld [vmem:[#allocation2 + $0x64] ss:$8 sps:$4 sm:$0xff]  }
   0xf   :  { %680 = vmatprep.subr.bf16.mxu1 %v892_v1  ;;  %640 = vmatpush1.bf16.msra.mxu0 %v894_v2  ;;  %v898_v5 = vld [vmem:[#allocation2 + $0x164] ss:$8 sps:$4 sm:$0xff]   ;;  %v900_v6 = vld [vmem:[#allocation2 + $0x60] ss:$8 sps:$4 sm:$0xff]   ;;  %v902_v8 = vld [vmem:[#allocation2 + $0x54] ss:$8 sps:$4 sm:$0xff]  }
  0x10   :  { %681 = vmatpush1.bf16.msra.mxu1 %v895_v3  ;;  %641 = vmatprep.subr.bf16.mxu0 %v896_v4  ;;  %v901_v7 = vld [vmem:[#allocation2 + $0x160] ss:$8 sps:$4 sm:$0xff]   ;;  %v904_v9 = vld [vmem:[#allocation2 + $0x154] ss:$8 sps:$4 sm:$0xff]   ;;  %v906_v10 = vld [vmem:[#allocation2 + $0x50] ss:$8 sps:$4 sm:$0xff]  }
  0x11   :  { %682 = vmatprep.subr.bf16.mxu1 %v898_v5  ;;  %v907_v11 = vld [vmem:[#allocation2 + $0x150] ss:$8 sps:$4 sm:$0xff]   ;;  %v908_v12 = vld [vmem:[#allocation2 + $0x44] ss:$8 sps:$4 sm:$0xff]   ;;  %v912_v14 = vld [vmem:[#allocation2 + $0x40] ss:$8 sps:$4 sm:$0xff]  }
  0x12   :  { %v910_v13 = vld [vmem:[#allocation2 + $0x144] ss:$8 sps:$4 sm:$0xff]   ;;  %v913_v15 = vld [vmem:[#allocation2 + $0x140] ss:$8 sps:$4 sm:$0xff]   ;;  %v914_v16 = vld [vmem:[#allocation2 + $0x34] ss:$8 sps:$4 sm:$0xff]  }
  0x13   :  { %642 = vmatpush1.bf16.msra.mxu0 %v900_v6  ;;  %v916_v17 = vld [vmem:[#allocation2 + $0x134] ss:$8 sps:$4 sm:$0xff]   ;;  %v918_v18 = vld [vmem:[#allocation2 + $0x30] ss:$8 sps:$4 sm:$0xff]   ;;  %v920_v20 = vld [vmem:[#allocation2 + $0x24] ss:$8 sps:$4 sm:$0xff]  }
  0x14   :  { %683 = vmatpush1.bf16.msra.mxu1 %v901_v7  ;;  %643 = vmatprep.subr.bf16.mxu0 %v902_v8  ;;  %v919_v19 = vld [vmem:[#allocation2 + $0x130] ss:$8 sps:$4 sm:$0xff]   ;;  %v922_v21 = vld [vmem:[#allocation2 + $0x124] ss:$8 sps:$4 sm:$0xff]   ;;  %v924_v22 = vld [vmem:[#allocation2 + $0x20] ss:$8 sps:$4 sm:$0xff]  }
  0x15   :  { %684 = vmatprep.subr.bf16.mxu1 %v904_v9  ;;  %v925_v23 = vld [vmem:[#allocation2 + $0x120] ss:$8 sps:$4 sm:$0xff]   ;;  %v926_v24 = vld [vmem:[#allocation2 + $0x14] ss:$8 sps:$4 sm:$0xff]   ;;  %v930_v26 = vld [vmem:[#allocation2 + $0x10] ss:$8 sps:$4 sm:$0xff]  }
  0x16   :  { %v928_v25 = vld [vmem:[#allocation2 + $0x114] ss:$8 sps:$4 sm:$0xff]   ;;  %v931_v27 = vld [vmem:[#allocation2 + $0x110] ss:$8 sps:$4 sm:$0xff]   ;;  %v932_v28 = vld [vmem:[#allocation2 + $0x4] ss:$8 sps:$4 sm:$0xff]  }
  0x17   :  { %644 = vmatpush1.bf16.msra.mxu0 %v906_v10  ;;  %v934_v29 = vld [vmem:[#allocation2 + $0x104] ss:$8 sps:$4 sm:$0xff]   ;;  %v936_v30 = vld [vmem:[#allocation2] ss:$8 sps:$4 sm:$0xff]   ;;  %v938_v32 = vld [vmem:[#allocation2 + $0xf4] ss:$8 sps:$4 sm:$0xff]  }
  0x18   :  { %685 = vmatpush1.bf16.msra.mxu1 %v907_v11  ;;  %645 = vmatprep.subr.bf16.mxu0 %v908_v12  ;;  %v937_v31 = vld [vmem:[#allocation2 + $0x100] ss:$8 sps:$4 sm:$0xff]   ;;  %v940_v33 = vld [vmem:[#allocation2 + $0x1f4] ss:$8 sps:$4 sm:$0xff]   ;;  %v942_v34 = vld [vmem:[#allocation2 + $0xf0] ss:$8 sps:$4 sm:$0xff]  }
  0x19   :  { %686 = vmatprep.subr.bf16.mxu1 %v910_v13  ;;  %v943_v35 = vld [vmem:[#allocation2 + $0x1f0] ss:$8 sps:$4 sm:$0xff]   ;;  %v944_v37 = vld [vmem:[#allocation2 + $0xe4] ss:$8 sps:$4 sm:$0xff]   ;;  %v948_v39 = vld [vmem:[#allocation2 + $0xe0] ss:$8 sps:$4 sm:$0xff]  }
  0x1a   :  { %v946_v38 = vld [vmem:[#allocation2 + $0x1e4] ss:$8 sps:$4 sm:$0xff]   ;;  %v1079_v40 = vshrl.u32 %v27_v36, 7  ;;  %v949_v41 = vld [vmem:[#allocation2 + $0x1e0] ss:$8 sps:$4 sm:$0xff]   ;;  %vm782_vm0 = vcmp.lt.s32.totalorder %v27_v36, 256 }
  0x1b   :  { %646 = vmatpush1.bf16.msra.mxu0 %v912_v14  ;;  %v950_v42 = vld [vmem:[#allocation2 + $0xd4] ss:$8 sps:$4 sm:$0xff]   ;;  %v954_v44 = vld [vmem:[#allocation2 + $0xd0] ss:$8 sps:$4 sm:$0xff]   ;;  %v956_v48 = vld [vmem:[#allocation2 + $0xc4] ss:$8 sps:$4 sm:$0xff]  }
  0x1c   :  { %687 = vmatpush1.bf16.msra.mxu1 %v913_v15  ;;  %647 = vmatprep.subr.bf16.mxu0 %v914_v16  ;;  %v952_v43 = vld [vmem:[#allocation2 + $0x1d4] ss:$8 sps:$4 sm:$0xff]   ;;  %v955_v45 = vld [vmem:[#allocation2 + $0x1d0] ss:$8 sps:$4 sm:$0xff]   ;;  %v33_v46 = vsub.s32 1, %v1079_v40  ;;  %v41_v47 = vsub.s32 3, %v1079_v40 }
  0x1d   :  { %688 = vmatprep.subr.bf16.mxu1 %v916_v17  ;;  %v958_v49 = vld [vmem:[#allocation2 + $0x1c4] ss:$8 sps:$4 sm:$0xff]   ;;  %v960_v51 = vld [vmem:[#allocation2 + $0xc0] ss:$8 sps:$4 sm:$0xff]   ;;  %v962_v55 = vld [vmem:[#allocation2 + $0xb4] ss:$8 sps:$4 sm:$0xff]  }
  0x1e   :  { %v1086_v50 = vld [vmem:[%s1103_s0] sm:$0x3f]  ;;  %v964_v56 = vld [vmem:[#allocation2 + $0x1b4] ss:$8 sps:$4 sm:$0xff]   ;;  %v966_v59 = vld [vmem:[#allocation2 + $0xb0] ss:$8 sps:$4 sm:$0xff]  }
  0x1f   :  { %648 = vmatpush1.bf16.msra.mxu0 %v918_v18  ;;  %v34_v52 = vrot.slane %v1086_v50, %v33_v46  ;;  %v42_v53 = vrot.slane %v1086_v50, %v41_v47  ;;  %v961_v54 = vld [vmem:[#allocation2 + $0x1c0] ss:$8 sps:$4 sm:$0xff]   ;;  %v967_v60 = vld [vmem:[#allocation2 + $0x1b0] ss:$8 sps:$4 sm:$0xff]   ;;  %v968_v61 = vld [vmem:[#allocation2 + $0xa4] ss:$8 sps:$4 sm:$0xff]  }
  0x20   :  { %689 = vmatpush1.bf16.msra.mxu1 %v919_v19  ;;  %649 = vmatprep.subr.bf16.mxu0 %v920_v20  ;;  %v970_v62 = vld [vmem:[#allocation2 + $0x1a4] ss:$8 sps:$4 sm:$0xff]   ;;  %v972_v63 = vld [vmem:[#allocation2 + $0xa0] ss:$8 sps:$4 sm:$0xff]   ;;  %v974_v1 = vld [vmem:[#allocation2 + $0x94] ss:$8 sps:$4 sm:$0xff]  }
  0x21   :  { %690 = vmatprep.subr.bf16.mxu1 %v922_v21  ;;  %v58_v57 = vpack.c.bf16 %v34_v52, %v34_v52  ;;  %v60_v58 = vpack.c.bf16 %v42_v53, %v42_v53  ;;  %v973_v0 = vld [vmem:[#allocation2 + $0x1a0] ss:$8 sps:$4 sm:$0xff]   ;;  %v976_v2 = vld [vmem:[#allocation2 + $0x194] ss:$8 sps:$4 sm:$0xff]   ;;  %v978_v3 = vld [vmem:[#allocation2 + $0x90] ss:$8 sps:$4 sm:$0xff]  }
  0x22   :  { %v29_v4 = vsub.s32 0, %v1079_v40  ;;  %v37_v5 = vsub.s32 2, %v1079_v40  ;;  %v979_v6 = vld [vmem:[#allocation2 + $0x190] ss:$8 sps:$4 sm:$0xff]   ;;  %v49_v7 = vsub.s32 5, %v1079_v40 }
  0x23   :  { %650 = vmatpush1.bf16.msra.mxu0 %v924_v22  ;;  %671 = vmatprep.mubr.bf16.mxu0 %v58_v57  ;;  %v980_v8 = vld [vmem:[#allocation2 + $0x84] ss:$8 sps:$4 sm:$0xff]   ;;  %v984_v10 = vld [vmem:[#allocation2 + $0x80] ss:$8 sps:$4 sm:$0xff]   ;;  %v988_v15 = vld [vmem:[#allocation2 + $0x274] ss:$8 sps:$4 sm:$0xff]  }
  0x24   :  { %691 = vmatpush1.bf16.msra.mxu1 %v925_v23  ;;  %651 = vmatprep.subr.bf16.mxu0 %v926_v24  ;;  %v982_v9 = vld [vmem:[#allocation2 + $0x184] ss:$8 sps:$4 sm:$0xff]   ;;  %v30_v11 = vrot.slane %v1086_v50, %v29_v4  ;;  %v38_v12 = vrot.slane %v1086_v50, %v37_v5  ;;  %v985_v13 = vld [vmem:[#allocation2 + $0x180] ss:$8 sps:$4 sm:$0xff]   ;;  %v50_v14 = vrot.slane %v1086_v50, %v49_v7  ;;  %v986_v18 = vld [vmem:[#allocation2 + $0x270] ss:$8 sps:$4 sm:$0xff]  }
  0x25   :  { %692 = vmatprep.subr.bf16.mxu1 %v928_v25  ;;  %712 = vmatprep.mubr.bf16.mxu1 %v60_v58  ;;  %v991_v20 = vld [vmem:[#allocation2 + $0x264] ss:$8 sps:$4 sm:$0xff]   ;;  %v989_v21 = vld [vmem:[#allocation2 + $0x260] ss:$8 sps:$4 sm:$0xff]   ;;  %v994_v22 = vld [vmem:[#allocation2 + $0x254] ss:$8 sps:$4 sm:$0xff]  }
  0x26   :  { %v57_v16 = vpack.c.bf16 %v30_v11, %v30_v11  ;;  %v59_v17 = vpack.c.bf16 %v38_v12, %v38_v12  ;;  %v62_v19 = vpack.c.bf16 %v50_v14, %v50_v14  ;;  %v992_v23 = vld [vmem:[#allocation2 + $0x250] ss:$8 sps:$4 sm:$0xff]   ;;  %v997_v24 = vld [vmem:[#allocation2 + $0x244] ss:$8 sps:$4 sm:$0xff]   ;;  %v995_v25 = vld [vmem:[#allocation2 + $0x240] ss:$8 sps:$4 sm:$0xff]  }
  0x27   :  { %652 = vmatpush1.bf16.msra.mxu0 %v930_v26  ;;  %v1000_v26 = vld [vmem:[#allocation2 + $0x234] ss:$8 sps:$4 sm:$0xff]   ;;  %v1027_v46 = vld [vmem:[#allocation2 + $0x2a4] ss:$8 sps:$4 sm:$0xff]   ;;  %v1025_v47 = vld [vmem:[#allocation2 + $0x2a0] ss:$8 sps:$4 sm:$0xff]  }
  0x28   :  { %693 = vmatpush1.bf16.msra.mxu1 %v931_v27  ;;  %653 = vmatprep.subr.bf16.mxu0 %v932_v28  ;;  %v998_v27 = vld [vmem:[#allocation2 + $0x230] ss:$8 sps:$4 sm:$0xff]   ;;  %v1003_v28 = vld [vmem:[#allocation2 + $0x224] ss:$8 sps:$4 sm:$0xff]  }
  0x29   :  { %694 = vmatprep.subr.bf16.mxu1 %v934_v29  ;;  %v1001_v29 = vld [vmem:[#allocation2 + $0x220] ss:$8 sps:$4 sm:$0xff]   ;;  %v1033_v52 = vld [vmem:[#allocation2 + $0x284] ss:$8 sps:$4 sm:$0xff]  }
  0x2b   :  { %654 = vmatpush1.bf16.msra.mxu0 %v936_v30  ;;  %v1006_v30 = vld [vmem:[#allocation2 + $0x214] ss:$8 sps:$4 sm:$0xff]  }
  0x2c   :  { %695 = vmatpush1.bf16.msra.mxu1 %v937_v31  ;;  %655 = vmatprep.subr.bf16.mxu0 %v938_v32  ;;  %v1004_v31 = vld [vmem:[#allocation2 + $0x210] ss:$8 sps:$4 sm:$0xff]   ;;  %v1009_v32 = vld [vmem:[#allocation2 + $0x204] ss:$8 sps:$4 sm:$0xff]  }
  0x2d   :  { %696 = vmatprep.subr.bf16.mxu1 %v940_v33  ;;  %v1007_v33 = vld [vmem:[#allocation2 + $0x200] ss:$8 sps:$4 sm:$0xff]  }
  0x2f   :  { %656 = vmatpush2.bf16.msra.mxu0 %v942_v34  ;;  %v1012_v34 = vld [vmem:[#allocation2 + $0x2f4] ss:$8 sps:$4 sm:$0xff]  }
  0x30   :  { %697 = vmatpush2.bf16.msra.mxu1 %v943_v35  ;;  %657 = vmatprep.subr.bf16.mxu0 %v944_v37  ;;  %v1010_v35 = vld [vmem:[#allocation2 + $0x2f0] ss:$8 sps:$4 sm:$0xff]   ;;  %v1015_v37 = vld [vmem:[#allocation2 + $0x2e4] ss:$8 sps:$4 sm:$0xff]  }
  0x31   :  { %698 = vmatprep.subr.bf16.mxu1 %v946_v38  ;;  %v1013_v38 = vld [vmem:[#allocation2 + $0x2e0] ss:$8 sps:$4 sm:$0xff]  }
  0x33   :  { %658 = vmatpush2.bf16.msra.mxu0 %v948_v39  ;;  %v1018_v39 = vld [vmem:[#allocation2 + $0x2d4] ss:$8 sps:$4 sm:$0xff]  }
  0x34   :  { %699 = vmatpush2.bf16.msra.mxu1 %v949_v41  ;;  %659 = vmatprep.subr.bf16.mxu0 %v950_v42  ;;  %v1016_v41 = vld [vmem:[#allocation2 + $0x2d0] ss:$8 sps:$4 sm:$0xff]   ;;  %v1021_v42 = vld [vmem:[#allocation2 + $0x2c4] ss:$8 sps:$4 sm:$0xff]  }
  0x35   :  { %700 = vmatprep.subr.bf16.mxu1 %v952_v43  ;;  %v1019_v43 = vld [vmem:[#allocation2 + $0x2c0] ss:$8 sps:$4 sm:$0xff]  }
  0x37   :  { %660 = vmatpush2.bf16.msra.mxu0 %v954_v44  ;;  %v1024_v44 = vld [vmem:[#allocation2 + $0x2b4] ss:$8 sps:$4 sm:$0xff]  }
  0x38   :  { %701 = vmatpush2.bf16.msra.mxu1 %v955_v45  ;;  %661 = vmatprep.subr.bf16.mxu0 %v956_v48  ;;  %v1022_v45 = vld [vmem:[#allocation2 + $0x2b0] ss:$8 sps:$4 sm:$0xff]   ;;  %v1030_v48 = vld [vmem:[#allocation2 + $0x294] ss:$8 sps:$4 sm:$0xff]  }
  0x39   :  { %702 = vmatprep.subr.bf16.mxu1 %v958_v49  ;;  %v45_v49 = vsub.s32 4, %v1079_v40 }
  0x3b   :  { %662 = vmatpush2.bf16.msra.mxu0 %v960_v51  ;;  %v1028_v51 = vld [vmem:[#allocation2 + $0x290] ss:$8 sps:$4 sm:$0xff]   ;;  %v46_v53 = vrot.slane %v1086_v50, %v45_v49 }
  0x3c   :  { %703 = vmatpush2.bf16.msra.mxu1 %v961_v54  ;;  %663 = vmatprep.subr.bf16.mxu0 %v962_v55  ;;  %v1031_v54 = vld [vmem:[#allocation2 + $0x280] ss:$8 sps:$4 sm:$0xff]  }
  0x3d   :  { %704 = vmatprep.subr.bf16.mxu1 %v964_v56  ;;  %v61_v55 = vpack.c.bf16 %v46_v53, %v46_v53 }
  0x3f   :  { %664 = vmatpush2.bf16.msra.mxu0 %v966_v59 }
  0x40   :  { %705 = vmatpush2.bf16.msra.mxu1 %v967_v60  ;;  %665 = vmatprep.subr.bf16.mxu0 %v968_v61 }
  0x41   :  { %706 = vmatprep.subr.bf16.mxu1 %v970_v62 }
  0x43   :  { %666 = vmatpush2.bf16.msra.mxu0 %v972_v63 }
  0x44   :  { %707 = vmatpush2.bf16.msra.mxu1 %v973_v0  ;;  %667 = vmatprep.subr.bf16.mxu0 %v974_v1  ;;  %v1059_v1 = vmov 1966171168  }
  0x45   :  { %708 = vmatprep.subr.bf16.mxu1 %v976_v2  ;;  %v766_v2 = vunpack.c.l.s4 %v1059_v1 }
  0x47   :  { %668 = vmatpush2.bf16.msra.mxu0 %v978_v3  ;;  %v767_v3 = vunpack.c.0.s8 %v766_v2 }
  0x48   :  { %709 = vmatpush2.bf16.msra.mxu1 %v979_v6  ;;  %669 = vmatprep.subr.bf16.mxu0 %v980_v8 }
  0x49   :  { %710 = vmatprep.subr.bf16.mxu1 %v982_v9  ;;  %v770_v8 = vsub.s32 %v767_v3, %v1079_v40 }
  0x4b   :  { %670 = vmatpush2.bf16.msra.mxu0 %v984_v10 }
  0x4c   :  { %711 = vmatpush2.bf16.msra.mxu1 %v985_v13  ;;  %721 = vmatprep.subr.bf16.mxu0 %v988_v15 }
  0x4e   :  { %672 = vmatmul.mubr.bf16.vlgmr.msra.gmra.mxu0 %v57_v16 }
  0x4f   :  { %713 = vmatmul.mubr.bf16.vlgmr.msra.gmra.mxu1 %v59_v17  ;;  %722 = vmatpush1.bf16.msra.mxu0 %v986_v18 }
  0x50   :  { %753 = vmatprep.mubr.bf16.mxu0 %v62_v19  ;;  %723 = vmatprep.subr.bf16.mxu0 %v991_v20 }
  0x53   :  { %724 = vmatpush1.bf16.msra.mxu0 %v989_v21 }
  0x54   :  { %725 = vmatprep.subr.bf16.mxu0 %v994_v22 }
  0x57   :  { %726 = vmatpush1.bf16.msra.mxu0 %v992_v23 }
  0x58   :  { %727 = vmatprep.subr.bf16.mxu0 %v997_v24 }
  0x5b   :  { %728 = vmatpush1.bf16.msra.mxu0 %v995_v25 }
  0x5c   :  { %729 = vmatprep.subr.bf16.mxu0 %v1000_v26 }
  0x5f   :  { %730 = vmatpush1.bf16.msra.mxu0 %v998_v27 }
  0x60   :  { %731 = vmatprep.subr.bf16.mxu0 %v1003_v28 }
  0x63   :  { %732 = vmatpush1.bf16.msra.mxu0 %v1001_v29 }
  0x64   :  { %733 = vmatprep.subr.bf16.mxu0 %v1006_v30 }
  0x67   :  { %734 = vmatpush1.bf16.msra.mxu0 %v1004_v31 }
  0x68   :  { %735 = vmatprep.subr.bf16.mxu0 %v1009_v32 }
  0x6b   :  { %736 = vmatpush1.bf16.msra.mxu0 %v1007_v33 }
  0x6c   :  { %737 = vmatprep.subr.bf16.mxu0 %v1012_v34 }
  0x6f   :  { %738 = vmatpush2.bf16.msra.mxu0 %v1010_v35 }
  0x70   :  { %739 = vmatprep.subr.bf16.mxu0 %v1015_v37 }
  0x73   :  { %740 = vmatpush2.bf16.msra.mxu0 %v1013_v38 }
  0x74   :  { %741 = vmatprep.subr.bf16.mxu0 %v1018_v39 }
  0x77   :  { %742 = vmatpush2.bf16.msra.mxu0 %v1016_v41 }
  0x78   :  { %743 = vmatprep.subr.bf16.mxu0 %v1021_v42 }
  0x7b   :  { %744 = vmatpush2.bf16.msra.mxu0 %v1019_v43 }
  0x7c   :  { %745 = vmatprep.subr.bf16.mxu0 %v1024_v44 }
  0x7f   :  { %746 = vmatpush2.bf16.msra.mxu0 %v1022_v45 }
  0x80   :  { %747 = vmatprep.subr.bf16.mxu0 %v1027_v46 }
  0x83   :  { %748 = vmatpush2.bf16.msra.mxu0 %v1025_v47 }
  0x84   :  { %749 = vmatprep.subr.bf16.mxu0 %v1030_v48 }
  0x87   :  { %750 = vmatpush2.bf16.msra.mxu0 %v1028_v51 }
  0x88   :  { %751 = vmatprep.subr.bf16.mxu0 %v1033_v52 }
  0x8b   :  { %752 = vmatpush2.bf16.msra.mxu0 %v1031_v54 }
  0x8e   :  { %754 = vmatmul.mubr.bf16.vlgmr.msra.gmra.mxu0 %v61_v55 }
 0x10e   :  { %v673_v56 = vpop.f32.mrf.mxu0 }
 0x10f   :  { %v714_v57 = vpop.f32.mrf.mxu1 }
 0x110   :  { %v715_v58 = vadd.f32 %v714_v57, %v673_v56  ;;  %v675_v59 = vpop.f32.mrf.mxu0 }
 0x111   :  { %v716_v60 = vpop.f32.mrf.mxu1 }
 0x112   :  { %v677_v61 = vpop.f32.mrf.mxu0  ;;  %v717_v50 = vadd.f32 %v716_v60, %v675_v59 }
 0x113   :  { %v718_v62 = vpop.f32.mrf.mxu1 }
 0x114   :  { %v678_v63 = vpop.f32.mrf.mxu0 }
 0x115   :  { %v719_v0 = vpop.f32.mrf.mxu1 }
 0x14e   :  { %v755_v4 = vpop.f32.mrf.mxu0 }
 0x14f   :  { %v756_v6 = vadd.f32 %v755_v4, %v715_v58 }
 0x150   :  { %v757_v5 = vpop.f32.mrf.mxu0 }
 0x151   :  { %v758_v7 = vadd.f32 %v757_v5, %v717_v50 }
 0x152   :  { %v759_v9 = vpop.f32.mrf.mxu0 }
 0x153   :  { %v764_v10 = vcombine.low %v756_v6, %v758_v7 }
 0x154   :  { %v760_v11 = vpop.f32.mrf.mxu0 }
 0x155   :  { %v771_v12 = vrot.slane %v764_v10, %v770_v8 }
 0x157   :  { %v778_v13 = vrot.slane %v771_v12, %v770_v8 }
 0x159   :  { %784 = vst.msk [vmem:[%s1105_s2] sm:$0x3] %vm782_vm0, %v778_v13 }
 0x15a   :  { %789 = vsyncpa [#allocation3], 1 }

</bundles_post_ra>
